<compile_context>
chip_gen: v7x
topology: tpu7x:2x2x1
jax: 0.10.0
libtpu: 0.0.40
codegen_flags: <defaults>
</compile_context>

<pallas_src>
import functools

import jax
import jax.numpy as jnp
from jax.experimental import pallas as pl
from jax.experimental.pallas import tpu as pltpu


def _round_up(x, m):
    return (x + m - 1) // m * m


def _pick_tk(kpad, cap):
    """Largest multiple of 128 that divides kpad and is <= cap."""
    cap = min(cap, kpad)
    for t in range(cap, 0, -128):
        if kpad % t == 0:
            return t
    return 128


# i/j grid axes are independent ("parallel", megacore-shardable on v7x), K is
# the sequential reduction.  vmem_limit raised above the v5e 16 MiB default so
# the (1024 x 4096) bf16 FC weight blocks double-buffer (~16 MiB); 48 MiB still
# leaves headroom under v7x's 64 MiB physical VMEM.
_MM_CPARAMS = pltpu.CompilerParams(
    dimension_semantics=("parallel", "parallel", "arbitrary"),
    vmem_limit_bytes=48 * 1024 * 1024)


# ----------------------------------------------------------------------------
# Fused tiled matmul kernels:  out = maybe_relu((A @ B) [* scale] + bias)
# A, B tiles are bf16 (MXU-native), accumulation + epilogue in f32.
# ----------------------------------------------------------------------------
def _mm_scale_bias_kernel(a_ref, b_ref, scale_ref, bias_ref, o_ref, acc_ref,
                          *, relu):
    @pl.when(pl.program_id(2) == 0)
    def _():
        acc_ref[...] = jnp.zeros_like(acc_ref)

    acc_ref[...] += jnp.dot(a_ref[...], b_ref[...],
                            preferred_element_type=jnp.float32)

    @pl.when(pl.program_id(2) == pl.num_programs(2) - 1)
    def _():
        y = acc_ref[...] * scale_ref[...] + bias_ref[...]
        if relu:
            y = jnp.maximum(y, 0.0)
        o_ref[...] = y.astype(o_ref.dtype)


def _mm_bias_kernel(a_ref, b_ref, bias_ref, o_ref, acc_ref, *, relu):
    @pl.when(pl.program_id(2) == 0)
    def _():
        acc_ref[...] = jnp.zeros_like(acc_ref)

    acc_ref[...] += jnp.dot(a_ref[...], b_ref[...],
                            preferred_element_type=jnp.float32)

    @pl.when(pl.program_id(2) == pl.num_programs(2) - 1)
    def _():
        y = acc_ref[...] + bias_ref[...]
        if relu:
            y = jnp.maximum(y, 0.0)
        o_ref[...] = y.astype(o_ref.dtype)


def pack_rhs(b_mat, scale, bias, *, wide_n):
    """One-time RHS pre-packing: pad to (128-multiple) tiles, cast to bf16.

    Padding is zeros, so padded K rows / N cols contribute nothing.
    wide_n=True  -> weight-streaming FC layout: tn = full Npad, tk <= 1024.
    wide_n=False -> conv layout: tn = 128 (>=2 parallel j blocks), whole-K tk.
    """
    K, N = b_mat.shape
    Kpad = _round_up(K, 128)
    Npad = _round_up(N, 128)
    if wide_n:
        tn = Npad
        tk = _pick_tk(Kpad, 1024)   # 8 MiB/buffer max: fits v7x 64 MiB VMEM
    else:
        tn = 128
        tk = _pick_tk(Kpad, 4096)   # whole-K single block for every conv
    b_p = jnp.zeros((Kpad, Npad), jnp.bfloat16).at[:K, :N].set(
        b_mat.astype(jnp.bfloat16))
    d_p = jnp.zeros((1, Npad), jnp.float32).at[0, :N].set(bias)
    s_p = None
    if scale is not None:
        s_p = jnp.zeros((1, Npad), jnp.float32).at[0, :N].set(scale)
    return {"b": b_p, "scale": s_p, "bias": d_p,
            "K": K, "N": N, "tk": tk, "tn": tn}


def matmul_packed(a, rhs, relu, out_dtype=jnp.float32):
    """out[m, n] = maybe_relu(sum_k a[m,k] b[k,n] [* scale[n]] + bias[n])."""
    M, K = a.shape
    assert K == rhs["K"]
    Kpad, Npad = rhs["b"].shape
    tk, tn = rhs["tk"], rhs["tn"]
    Mpad = _round_up(M, 16)                       # bf16 sublane packing
    tm = 256 if (Mpad % 256 == 0 and Mpad >= 256) else Mpad

    a_p = a.astype(jnp.bfloat16)
    if (Mpad, Kpad) != (M, K):
        a_p = jnp.pad(a_p, ((0, Mpad - M), (0, Kpad - K)))

    grid = (Mpad // tm, Npad // tn, Kpad // tk)
    a_spec = pl.BlockSpec((tm, tk), lambda i, j, k: (i, k))
    b_spec = pl.BlockSpec((tk, tn), lambda i, j, k: (k, j))
    v_spec = pl.BlockSpec((1, tn), lambda i, j, k: (0, j))
    o_spec = pl.BlockSpec((tm, tn), lambda i, j, k: (i, j))
    scratch = [pltpu.VMEM((tm, tn), jnp.float32)]
    out_shape = jax.ShapeDtypeStruct((Mpad, Npad), out_dtype)

    if rhs["scale"] is not None:
        out = pl.pallas_call(
            functools.partial(_mm_scale_bias_kernel, relu=relu),
            out_shape=out_shape, grid=grid,
            in_specs=[a_spec, b_spec, v_spec, v_spec],
            out_specs=o_spec, scratch_shapes=scratch,
            compiler_params=_MM_CPARAMS,
        )(a_p, rhs["b"], rhs["scale"], rhs["bias"])
    else:
        out = pl.pallas_call(
            functools.partial(_mm_bias_kernel, relu=relu),
            out_shape=out_shape, grid=grid,
            in_specs=[a_spec, b_spec, v_spec],
            out_specs=o_spec, scratch_shapes=scratch,
            compiler_params=_MM_CPARAMS,
        )(a_p, rhs["b"], rhs["bias"])

    if Mpad != M:
        out = out[:M]
    if Npad != rhs["N"]:
        out = out[:, :rhs["N"]]
    return out


# ----------------------------------------------------------------------------
# MaxPool 3x3 stride-2 (no padding): one grid step per image.
# Three stride-2 column pre-slices feed whole-image (1, H, Wo, C) blocks; the
# 3 row-shifted maxima are computed in-kernel with static indexing.
# ----------------------------------------------------------------------------
def _maxpool_kernel(c0_ref, c1_ref, c2_ref, o_ref, *, ho):
    # Column (dw) maxima over the full row range, then row-shifted maxima.
    m = jnp.maximum(jnp.maximum(c0_ref[0], c1_ref[0]), c2_ref[0])  # (H, Wo, C)
    for i in range(ho):
        o_ref[0, i] = jnp.maximum(jnp.maximum(m[2 * i], m[2 * i + 1]),
                                  m[2 * i + 2])


def maxpool_3x3_s2(x):
    # x: (N, H, W, C) NHWC
    N, H, W, C = x.shape
    Ho = (H - 3) // 2 + 1
    Wo = (W - 3) // 2 + 1
    # Three stride-2 column pre-slices (plain XLA strided slices, ~1.3x of x).
    # TODO(synk): pull the stride-2 column selection into the kernel too
    # (pl.ds(..., stride=2) loads) so x is read exactly once.
    cols = [x[:, :, dw:dw + 2 * (Wo - 1) + 1:2, :] for dw in range(3)]
    in_specs = [pl.BlockSpec((1, H, Wo, C), lambda n: (n, 0, 0, 0))
                for _ in range(3)]
    return pl.pallas_call(
        functools.partial(_maxpool_kernel, ho=Ho),
        out_shape=jax.ShapeDtypeStruct((N, Ho, Wo, C), x.dtype),
        grid=(N,),
        in_specs=in_specs,
        out_specs=pl.BlockSpec((1, Ho, Wo, C), lambda n: (n, 0, 0, 0)),
        compiler_params=pltpu.CompilerParams(
            dimension_semantics=("parallel",)),
    )(*cols)


# ----------------------------------------------------------------------------
# Glue: im2col patch extraction, adaptive avg pool (tiny), layer wrappers
# ----------------------------------------------------------------------------
def im2col(x, kh, kw, stride, pad):
    # TODO(synk): implicit im2col (kh*kw folded into the matmul grid with
    # shifted-window LHS index maps / manual DMA) would avoid materializing
    # kh*kw activation copies; at these shapes the forward is dominated by FC
    # weight streaming, so the explicit (bf16) patch matrix is kept.
    N, H, W, C = x.shape
    xp = jnp.pad(x, ((0, 0), (pad, pad), (pad, pad), (0, 0)))
    Hp, Wp = H + 2 * pad, W + 2 * pad
    Ho = (Hp - kh) // stride + 1
    Wo = (Wp - kw) // stride + 1
    patches = []
    for di in range(kh):
        for dj in range(kw):
            patches.append(xp[:, di:di + stride * (Ho - 1) + 1:stride,
                              dj:dj + stride * (Wo - 1) + 1:stride, :])
    patches = jnp.stack(patches, axis=3)  # (N, Ho, Wo, kh*kw, C)
    return patches.reshape(N * Ho * Wo, kh * kw * C), (N, Ho, Wo)


def conv_bn_relu(x, packed_conv):
    rhs, kh, kw, cin, cout = packed_conv
    pad = kh // 2
    a, (n, ho, wo) = im2col(x.astype(jnp.bfloat16), kh, kw, 1, pad)
    out = matmul_packed(a, rhs, relu=True, out_dtype=jnp.bfloat16)
    return out.reshape(n, ho, wo, cout)


def adaptive_avg_pool(x, out_h, out_w):
    # AdaptiveAvgPool2d semantics; windows are static and tiny -> plain JAX glue.
    x = x.astype(jnp.float32)
    N, H, W, C = x.shape
    rows = []
    for i in range(out_h):
        h0 = (i * H) // out_h
        h1 = -(-((i + 1) * H) // out_h)
        cols = []
        for j in range(out_w):
            w0 = (j * W) // out_w
            w1 = -(-((j + 1) * W) // out_w)
            cols.append(jnp.mean(x[:, h0:h1, w0:w1, :], axis=(1, 2)))
        rows.append(jnp.stack(cols, axis=1))
    return jnp.stack(rows, axis=1)  # (N, out_h, out_w, C)


# ----------------------------------------------------------------------------
# Model parameters: raw init + one-time pre-packing (BN fold, transpose,
# pad-to-tiles, bf16 cast).  Pre-packing runs once, NOT per forward call.
# ----------------------------------------------------------------------------
def init_params(key, num_classes):
    conv_cfg = [(1, 64, 5), (64, 192, 5), (192, 384, 3), (384, 256, 3),
                (256, 256, 3)]
    params = {"convs": [], "fcs": []}
    for cin, cout, k in conv_cfg:
        key, k1, k2, k3, k4, k5, k6 = jax.random.split(key, 7)
        w = jax.random.normal(k1, (cout, cin, k, k), jnp.float32) * 0.05
        b = jax.random.normal(k2, (cout,), jnp.float32) * 0.05
        gamma = 1.0 + 0.1 * jax.random.normal(k3, (cout,), jnp.float32)
        beta = 0.1 * jax.random.normal(k4, (cout,), jnp.float32)
        mean = 0.1 * jax.random.normal(k5, (cout,), jnp.float32)
        var = jax.random.uniform(k6, (cout,), jnp.float32, minval=0.5,
                                 maxval=1.5)
        params["convs"].append((w, b, gamma, beta, mean, var))
    fc_cfg = [(256 * 4 * 6, 4096), (4096, 4096), (4096, num_classes)]
    for fin, fout in fc_cfg:
        key, k1, k2 = jax.random.split(key, 3)
        w = jax.random.normal(k1, (fout, fin), jnp.float32) * 0.02
        b = jax.random.normal(k2, (fout,), jnp.float32) * 0.02
        params["fcs"].append((w, b))
    return params


def prepack_params(params):
    packed = {"convs": [], "fcs": []}
    for (w, b, gamma, beta, mean, var) in params["convs"]:
        cout, cin, kh, kw = w.shape
        wmat = jnp.transpose(w, (2, 3, 1, 0)).reshape(kh * kw * cin, cout)
        inv_std = 1.0 / jnp.sqrt(var + 1e-5)
        scale = gamma * inv_std                       # BN fold (running stats)
        bias = beta + (b - mean) * scale
        packed["convs"].append(
            (pack_rhs(wmat, scale, bias, wide_n=False), kh, kw, cin, cout))
    # TODO(synk): int8 (v5e/v6e) / fp8 (v7x) FC weight storage with per-channel
    # dequant folded into the epilogue scale would halve classifier HBM traffic.
    for (w, b) in params["fcs"]:
        packed["fcs"].append(pack_rhs(jnp.transpose(w), None, b, wide_n=True))
    return packed


# ----------------------------------------------------------------------------
# Forward
# ----------------------------------------------------------------------------
def alexnet_forward(x_nchw, packed):
    x = jnp.transpose(x_nchw, (0, 2, 3, 1))  # NCHW -> NHWC
    convs = packed["convs"]
    # Note: conv1's 64 output channels are kept at true width (padding C to 128
    # through pool1 would double conv2's K / zero MXU work at these shapes).
    x = conv_bn_relu(x, convs[0])
    x = maxpool_3x3_s2(x)
    x = conv_bn_relu(x, convs[1])
    x = maxpool_3x3_s2(x)
    x = conv_bn_relu(x, convs[2])
    x = conv_bn_relu(x, convs[3])
    x = conv_bn_relu(x, convs[4])
    x = maxpool_3x3_s2(x)
    x = adaptive_avg_pool(x, 4, 6)                       # (N, 4, 6, 256)
    # torch.flatten(x, 1) operates on NCHW -> flatten in (C, H, W) order.
    n_batch = x.shape[0]
    x = jnp.transpose(x, (0, 3, 1, 2)).reshape(n_batch, -1)  # (N, 256*4*6)
    # Pad the batch rows to a sublane multiple ONCE and carry it through the
    # classifier (the 4096-wide dims are already tile aligned, so there are no
    # per-layer pad/slice round trips); logits are sliced back at the end.
    m_pad = _round_up(n_batch, 16)
    if m_pad != n_batch:
        x = jnp.pad(x, ((0, m_pad - n_batch), (0, 0)))
    # classifier (eval mode: Dropout = identity)
    # TODO(synk): training-mode Dropout / batch-stat BatchNorm not implemented.
    fcs = packed["fcs"]
    x = matmul_packed(x, fcs[0], relu=True, out_dtype=jnp.bfloat16)
    x = matmul_packed(x, fcs[1], relu=True, out_dtype=jnp.bfloat16)
    x = matmul_packed(x, fcs[2], relu=False, out_dtype=jnp.float32)
    return x[:n_batch]


if __name__ == "__main__":
    key = jax.random.PRNGKey(0)
    pkey, xkey = jax.random.split(key)
    num_classes = 10
    params = init_params(pkey, num_classes)
    packed = prepack_params(params)          # one-time weight pre-packing
    x = jax.random.normal(xkey, (2, 1, 16, 16), jnp.float32)  # N=2, C=1, 16x16
    out = alexnet_forward(x, packed)
    out = jax.block_until_ready(out)
    assert out.shape == (2, num_classes)
    assert bool(jnp.all(jnp.isfinite(out)))
    print("KERNEL_OK")
</pallas_src>

<mosaic_0001>
module attributes {stable_mosaic.version = 11 : i64} {
  func.func @_mm_scale_bias_kernel(%arg0: i32, %arg1: i32, %arg2: i32, %arg3: memref<256x128xbf16, #tpu.memory_space<vmem>>, %arg4: memref<128x128xbf16, #tpu.memory_space<vmem>>, %arg5: memref<1x128xf32, #tpu.memory_space<vmem>>, %arg6: memref<1x128xf32, #tpu.memory_space<vmem>>, %arg7: memref<256x128xbf16, #tpu.memory_space<vmem>>, %arg8: memref<256x128xf32, #tpu.memory_space<vmem>>) attributes {dimension_semantics = [#tpu.dimension_semantics<parallel>, #tpu.dimension_semantics<parallel>, #tpu.dimension_semantics<arbitrary>], iteration_bounds = array<i64: 2, 1, 1>, scalar_prefetch = 0 : i64, scratch_operands = 1 : i64, tpu.core_type = #tpu.core_type<tc>, window_params = [{transform_indices = @transform_0, window_bounds = array<i64: 256, 128>}, {transform_indices = @transform_1, window_bounds = array<i64: 128, 128>}, {transform_indices = @transform_2, window_bounds = array<i64: 1, 128>}, {transform_indices = @transform_3, window_bounds = array<i64: 1, 128>}, {transform_indices = @transform_4, window_bounds = array<i64: 256, 128>}]} {
    %c0_i32 = arith.constant 0 : i32
    %0 = arith.cmpi eq, %arg2, %c0_i32 : i32
    %1 = arith.extui %0 : i1 to i32
    %c0_i32_0 = arith.constant 0 : i32
    %2 = arith.cmpi ne, %1, %c0_i32_0 : i32
    scf.if %2 {
      %cst_10 = arith.constant 0.000000e+00 : f32
      %12 = vector.broadcast %cst_10 : f32 to vector<256x128xf32>
      %c0_11 = arith.constant 0 : index
      %c0_12 = arith.constant 0 : index
      %13 = vector.load %arg8[%c0_11, %c0_12] : memref<256x128xf32, #tpu.memory_space<vmem>>, vector<256x128xf32>
      tpu.vector_store %arg8[%c0_11, %c0_12], %12 {strides = array<i32>} : memref<256x128xf32, #tpu.memory_space<vmem>>, vector<256x128xf32>,
    } else {
    }
    %c0 = arith.constant 0 : index
    %c0_1 = arith.constant 0 : index
    %3 = vector.load %arg8[%c0, %c0_1] : memref<256x128xf32, #tpu.memory_space<vmem>>, vector<256x128xf32>
    %c0_2 = arith.constant 0 : index
    %c0_3 = arith.constant 0 : index
    %4 = vector.load %arg3[%c0_2, %c0_3] : memref<256x128xbf16, #tpu.memory_space<vmem>>, vector<256x128xbf16>
    %c0_4 = arith.constant 0 : index
    %c0_5 = arith.constant 0 : index
    %5 = vector.load %arg4[%c0_4, %c0_5] : memref<128x128xbf16, #tpu.memory_space<vmem>>, vector<128x128xbf16>
    %cst = arith.constant dense<0.000000e+00> : vector<256x128xf32>
    %6 = tpu.matmul %4, %5, %cst {dimension_numbers = #tpu.dot_dimension_numbers<[1], [0], [0], [1], [0, 0, 1, 1], [], []>} : vector<256x128xbf16>, vector<128x128xbf16>, vector<256x128xf32> -> vector<256x128xf32>
    %7 = arith.addf %3, %6 : vector<256x128xf32>
    %c0_6 = arith.constant 0 : index
    %c0_7 = arith.constant 0 : index
    %8 = vector.load %arg8[%c0_6, %c0_7] : memref<256x128xf32, #tpu.memory_space<vmem>>, vector<256x128xf32>
    tpu.vector_store %arg8[%c0_6, %c0_7], %7 {strides = array<i32>} : memref<256x128xf32, #tpu.memory_space<vmem>>, vector<256x128xf32>,
    %c0_i32_8 = arith.constant 0 : i32
    %9 = arith.cmpi eq, %arg2, %c0_i32_8 : i32
    %10 = arith.extui %9 : i1 to i32
    %c0_i32_9 = arith.constant 0 : i32
    %11 = arith.cmpi ne, %10, %c0_i32_9 : i32
    scf.if %11 {
      %c0_10 = arith.constant 0 : index
      %c0_11 = arith.constant 0 : index
      %12 = vector.load %arg8[%c0_10, %c0_11] : memref<256x128xf32, #tpu.memory_space<vmem>>, vector<256x128xf32>
      %c0_12 = arith.constant 0 : index
      %c0_13 = arith.constant 0 : index
      %13 = vector.load %arg5[%c0_12, %c0_13] : memref<1x128xf32, #tpu.memory_space<vmem>>, vector<1x128xf32>
      %14 = vector.broadcast %13 : vector<1x128xf32> to vector<256x128xf32>
      %15 = arith.mulf %12, %14 : vector<256x128xf32>
      %c0_14 = arith.constant 0 : index
      %c0_15 = arith.constant 0 : index
      %16 = vector.load %arg6[%c0_14, %c0_15] : memref<1x128xf32, #tpu.memory_space<vmem>>, vector<1x128xf32>
      %17 = vector.broadcast %16 : vector<1x128xf32> to vector<256x128xf32>
      %18 = arith.addf %15, %17 : vector<256x128xf32>
      %cst_16 = arith.constant 0.000000e+00 : f32
      %19 = vector.broadcast %cst_16 : f32 to vector<256x128xf32>
      %20 = arith.maximumf %18, %19 : vector<256x128xf32>
      %21 = arith.truncf %20 : vector<256x128xf32> to vector<256x128xbf16>
      %c0_17 = arith.constant 0 : index
      %c0_18 = arith.constant 0 : index
      %22 = vector.load %arg7[%c0_17, %c0_18] : memref<256x128xbf16, #tpu.memory_space<vmem>>, vector<256x128xbf16>
      tpu.vector_store %arg7[%c0_17, %c0_18], %21 {strides = array<i32>} : memref<256x128xbf16, #tpu.memory_space<vmem>>, vector<256x128xbf16>,
    } else {
    }
    return
  }
  func.func @transform_0(%arg0: i32, %arg1: i32, %arg2: i32) -> (i32, i32) {
    %c0_i32 = arith.constant 0 : i32
    return %arg0, %arg2 : i32, i32
  }
  func.func @transform_1(%arg0: i32, %arg1: i32, %arg2: i32) -> (i32, i32) {
    %c0_i32 = arith.constant 0 : i32
    return %arg2, %arg1 : i32, i32
  }
  func.func @transform_2(%arg0: i32, %arg1: i32, %arg2: i32) -> (i32, i32) {
    %c0_i32 = arith.constant 0 : i32
    %c0_i32_0 = arith.constant 0 : i32
    return %c0_i32, %arg1 : i32, i32
  }
  func.func @transform_3(%arg0: i32, %arg1: i32, %arg2: i32) -> (i32, i32) {
    %c0_i32 = arith.constant 0 : i32
    %c0_i32_0 = arith.constant 0 : i32
    return %c0_i32, %arg1 : i32, i32
  }
  func.func @transform_4(%arg0: i32, %arg1: i32, %arg2: i32) -> (i32, i32) {
    %c0_i32 = arith.constant 0 : i32
    return %arg0, %arg1 : i32, i32
  }
}

</mosaic_0001>

<bundles_post_ra>
// kernel: tpu_custom_call.1
= control target key start
LH: loop header
LB: loop body
LE: loop exit
PB: predicated region body
PF: predicated region fallthrough
CT: control target
= control target key end

     0   :  { %9 = vsyncpa [#allocation4], 0  ;;  %s2142_s0 = inlined_call_operand.hbm [shape: bf16[512,128], index: 0, kind: input, shape index: {}]   ;;  %s2143_s1 = inlined_call_operand.hbm [shape: bf16[128,128], index: 1, kind: input, shape index: {}]   ;;  %s2144_s2 = inlined_call_operand.vmem [shape: f32[1,128], index: 2, kind: input, shape index: {}]   ;;  %s2145_s3 = inlined_call_operand.vmem [shape: f32[1,128], index: 3, kind: input, shape index: {}]   ;;  %s2146_s4 = inlined_call_operand.hbm [shape: bf16[512,128], index: 4, kind: output, shape index: {}]  }
   0x1   :  { %11 = vsyncpa [#allocation4 + $0x1], 0 }
   0x2   :  { %12 = vsyncpa [#allocation7], 0 }
   0x3   :  { %13 = vsyncpa [#allocation5], 0 }
   0x4   :  { %15 = vsyncpa [#allocation5 + $0x1], 0  ;;  %s1802_s15 = smov 0   ;;  %s1804_s16 = smov 0  }
   0x5   :  { %s1806_s17 = smov 0   ;;  %s1808_s18 = smov 0  }
   0x6   :  { %s1810_s19 = smov 0   ;;  %s1812_s20 = smov 0  }
   0x7 LB: > { %s1229_s21 = sadd.s32 4294967295, %s1768_s20   ;;  %s1230_s22 = sadd.s32 4294967294, %s1768_s20   ;;  %s1768_s20 = sphi %s1812_s20, %s21_s20   ;;  %s1764_s19 = sphi %s1810_s19, %s2170_s19   ;;  %s1760_s18 = sphi %s1808_s18, %s2169_s18   ;;  %s1756_s17 = sphi %s1806_s17, %s2168_s17   ;;  %s1752_s16 = sphi %s1804_s16, %s2167_s16   ;;  %s1748_s15 = sphi %s1802_s15, %s2166_s15  }
   0x8   : > { %p62_p0 = scmp.ne.s32.totalorder %s1752_s16, %s1748_s15  ;;  %p1836_p1 = scmp.eq.s32.totalorder %s1229_s21, 0 }
   0x9   : > { %p1840_p2 = scmp.eq.s32.totalorder %s1229_s21, 1  ;;  %p174_p3 = scmp.eq.s32.totalorder %s1230_s22, 1 }
   0xa   : > { %s2151_s23 = scalar_select %p1836_p1, 1, 0 }
   0xb   : > { %s2152_s24 = scalar_select %p1840_p2, 1, 0 }
   0xc   : > { %p1846_p4 = por %p1836_p1, %p62_p0  ;;  %p1231_p5 = scmp.ge.s32.totalorder %s1768_s20, 1 }
   0xd   : > { %p1851_p6 = por %p174_p3, %p62_p0  ;;  %p181_p7 = scmp.lt.s32.totalorder %s1768_s20, 3 }
   0xe   : > { %s2153_s25 = scalar_select %p1846_p4, 1, 0 }
   0xf   : > { %s2154_s26 = scalar_select %p1851_p6, 1, 0 }
  0x10   : > { %p1856_p8 = pnand %p1231_p5, %p181_p7  ;;  %s1770_s28 = smov [#allocation6]  }
  0x11   : > { %s197_s29 = sshll.u32 %s1770_s28, 4  ;;  %s40_s5 = sadd.s32 1, %s1764_s19  ;;  %s198_s29 = int_to_ptr.vmem [resolvable:$true] %s197_s29 }
  0x12   : > { %s2155_s27 = scalar_select %p1856_p8, 1, 0 }
  0x13   : > { %p1531_p9 = pneg %p1856_p8  ;;  %s1624_s8 = scalar_lea.hbm %s2143_s1, 1024 }
  0x14   : > { %p1625_p12 = scmp.ne.s32.totalorder %s2143_s1, %s1624_s8  ;;  %p1631_p5 = scmp.lt.u32.totalorder %s1624_s8, %s2143_s1 }
  0x15   : > { %p1865_p11 = pnand %p1531_p9, %p1836_p1 }
  0x17   : > { %p1626_p13 = pneg %p1865_p11 }
  0x19   : > { %p1627_p0 = pnand %p1626_p13, %p1625_p12 }
  0x1b   : > { %p1628_p3 = pneg %p1627_p0 }
  0x1d   : > { %p1633_p7 = pnand %p1631_p5, %p1628_p3 }
  0x1f   : > { %1636 = shalt.err (!%p1633_p7)
}
  0x20   : > { %s1637_s13 = scalar_lea.vmem %s198_s29, 1024  ;;  %p1645_p1 = scmp.lt.s32.totalorder %s198_s29, %s198_s29 }
  0x21   : > { %p1638_p9 = scmp.ne.s32.totalorder %s198_s29, %s1637_s13  ;;  %p1646_p4 = scmp.lt.s32.totalorder %s1637_s13, %s1637_s13 }
  0x23   : > { %p1640_p10 = pnand %p1638_p9, %p1626_p13  ;;  %p1647_p8 = por %p1646_p4, %p1645_p1 }
  0x25   : > { %p1641_p6 = pneg %p1640_p10 }
  0x27   : > { %p1648_p2 = pnand %p1647_p8, %p1641_p6 }
  0x29   : > { %1651 = shalt.err (!%p1648_p2)
}
  0x2a   : > { %s1771_s14 = smov 64   ;;  %s1772_s21 = smov 4  }
  0x2b   : > { %1534 = dma.hbm_to_vmem [thread:$0]  (!%p1865_p11), %s2143_s1, 1024, %s198_s29, [#allocation7], %s1771_s14, %s1771_s14, %s1772_s21  }
  0x2c   : > { %p42_p1 = scmp.ge.s32.totalorder %s40_s5, 2  ;;  %s49_s6 = sadd.s32 1, %s1756_s17 }
  0x2d   : > { %p56_p2 = scmp.ne.s32.totalorder %s1756_s17, %s1752_s16  ;;  %p57_p4 = scmp.eq.s32.totalorder %s1768_s20, 0 }
  0x2e   : > { %s2172_s5 = smov (%p42_p1, %s40_s5), 0  ;;  %p2158_p8 = scmp.ne.s32.totalorder %s2152_s24, 0 }
  0x2f   : > { %p1895_p6 = por %p57_p4, %p56_p2  ;;  %s44_s8 = ssub.s32 %s1764_s19, %s2172_s5 }
  0x30   : > { %p1901_p10 = por %p2158_p8, %p56_p2  ;;  %p1544_p12 = scmp.lt.s32.totalorder %s1768_s20, 2 }
  0x31   : > { %p47_p11 = scmp.eq.s32.totalorder %s44_s8, 0  ;;  %s223_s29 = sand.u32 1, %s1756_s17  }
  0x32   : > { %s1236_s9 = sshll.u32 %s223_s29, 7  ;;  %s1306_s11 = sshll.u32 %s1764_s19, 11 }
  0x33   : > { %s1910_s10 = scalar_select %p47_p11, %s1756_s17, %s49_s6  }
  0x34   : > { %s1916_s22 = scalar_lea.hbm %s2142_s0, %s1306_s11  ;;  %s227_s24 = scalar_lea.vmem [#allocation3], %s1236_s9 }
  0x35   : > { %s235_s28 = sshll.u32 %s227_s24, 4  ;;  %p1922_p13 = pnand %p1544_p12, %p1895_p6  ;;  %s1918_s28 = int_to_ptr.vmem [resolvable:$true] %s235_s28 }
  0x36   : > { %s1926_s6 = scalar_lea.sflag [#allocation4], %s223_s29  ;;  %s1652_s12 = scalar_lea.hbm %s1916_s22, 2048 }
  0x37   : > { %p1653_p0 = scmp.ne.s32.totalorder %s1916_s22, %s1652_s12  ;;  %p1654_p3 = pneg %p1922_p13 }
  0x38   : > { %s1657_s7 = scalar_lea.hbm %s2142_s0, 4096  ;;  %p1658_p9 = scmp.lt.u32.totalorder %s1916_s22, %s2142_s0 }
  0x39   : > { %p1655_p5 = pnand %p1654_p3, %p1653_p0  ;;  %p1659_p1 = scmp.lt.u32.totalorder %s1657_s7, %s1652_s12 }
  0x3a   : > { %p1661_p4 = scmp.lt.u32.totalorder %s1652_s12, %s1916_s22 }
  0x3b   : > { %p1656_p7 = pneg %p1655_p5  ;;  %p1660_p2 = por %p1659_p1, %p1658_p9 }
  0x3d   : > { %p1662_p6 = por %p1661_p4, %p1660_p2 }
  0x3f   : > { %p1663_p8 = pnand %p1662_p6, %p1656_p7 }
  0x41   : > { %1666 = shalt.err (!%p1663_p8)
}
  0x42   : > { %s1667_s29 = scalar_lea.vmem %s1918_s28, 2048  ;;  %s1773_s9 = smov [#allocation3]  }
  0x43   : > { %p1668_p12 = scmp.ne.s32.totalorder %s1918_s28, %s1667_s29  ;;  %s1672_s11 = sshll.u32 %s1773_s9, 4  ;;  %s1673_s11 = int_to_ptr.vmem [resolvable:$false] %s1672_s11 }
  0x44   : > { %s1674_s13 = scalar_lea.vmem %s1673_s11, 4096  ;;  %p1675_p5 = scmp.lt.s32.totalorder %s1918_s28, %s1673_s11 }
  0x45   : > { %p1670_p11 = pnand %p1668_p12, %p1654_p3  ;;  %p1676_p9 = scmp.lt.s32.totalorder %s1674_s13, %s1667_s29 }
  0x47   : > { %p1671_p0 = pneg %p1670_p11  ;;  %p1677_p1 = por %p1676_p9, %p1675_p5 }
  0x49   : > { %p1678_p2 = pnand %p1677_p1, %p1671_p0 }
  0x4b   : > { %1681 = shalt.err (!%p1678_p2)
}
  0x4c   : > { %1538 = dma.hbm_to_vmem [thread:$0]  (!%p1922_p13), %s1916_s22, 2048, %s1918_s28, %s1926_s6, %s1771_s14, %s1771_s14, %s1772_s21  }
  0x4d   : > { %p2161_p3 = scmp.ne.s32.totalorder %s2155_s27, 0 }
  0x4e   : > { %s1960_s12 = sand.u32 (!%p2161_p3), 1, %s1752_s16   ;;  %p2162_p7 = scmp.ne.s32.totalorder (!%p2161_p3), %s2153_s25, 0 }
  0x4f   : > { %247 = sbr.rel (%p2161_p3) target bundleno = 386 (0x182), region = 36  ;;  %s1240_s7 = sshll.u32 (!%p2161_p3), %s1960_s12, 7 }
  0x50   : > { %s250_s24 = scalar_lea.sflag (!%p2161_p3), [#allocation4], %s1960_s12  ;;  %s1966_s8 = scalar_lea.vmem (!%p2161_p3), [#allocation3], %s1240_s7 }
  0x56   : > { %1735 = dma.done.wait (%p2162_p7), %s250_s24, 2048  }
  0x57   : > { %1737 = vsyncadd (%p2162_p7), %s250_s24, 4294965248  ;;  %p2163_p13 = scmp.ne.s32.totalorder %s2151_s23, 0 }
  0x59   : > { %1739 = dma.done.wait (%p2163_p13), [#allocation7], 1024  }
  0x5a   : > { %1741 = vsyncadd (%p2163_p13), [#allocation7], 4294966272  ;;  %v1600_v0 = vld [vmem:[#allocation6] sm:$0xff]   ;;  %v1601_v1 = vld [vmem:[#allocation6 + $0x8] sm:$0xff]   ;;  %s2024_s21 = scalar_lea.vmem [#allocation8], %s1240_s7  ;;  %s1339_s22 = sshll.u32 %s1760_s18, 11 }
  0x5b   : > { %1459 = vmatprep.subr.bf16.mxu0 %v1600_v0  ;;  %1507 = vmatprep.subr.bf16.mxu1 %v1600_v0  ;;  %v1602_v2 = vld [vmem:[#allocation6 + $0x10] sm:$0xff]   ;;  %v1603_v3 = vld [vmem:[#allocation6 + $0x18] sm:$0xff]   ;;  %v1608_v4 = vld [vmem:[%s1966_s8] sm:$0xff]   ;;  %s1103_s28 = sshll.u32 %s2024_s21, 4  ;;  %s2087_s18 = scalar_lea.hbm %s2146_s4, %s1339_s22  ;;  %s2089_s28 = int_to_ptr.vmem [resolvable:$true] %s1103_s28 }
  0x5c   : > { %1460 = vmatpush3.bf16.msra.mxu0 %v1600_v0  ;;  %1515 = vmatpush3.bf16.msra.mxu1 %v1600_v0  ;;  %v1609_v5 = vld [vmem:[%s1966_s8 + $0x40] sm:$0xff]   ;;  %v1605_v7 = vld [vmem:[#allocation6 + $0x28] sm:$0xff]   ;;  %v1606_v8 = vld [vmem:[#allocation6 + $0x30] sm:$0xff]   ;;  %s1089_s9 = scalar_lea.sflag [#allocation5], %s1960_s12  ;;  %s1682_s11 = scalar_lea.vmem %s2089_s28, 2048 }
  0x5d   : > { %1461 = vmatprep.subr.bf16.mxu0 %v1601_v1  ;;  %1508 = vmatprep.subr.bf16.mxu1 %v1601_v1  ;;  %v1604_v6 = vld [vmem:[#allocation6 + $0x20] sm:$0xff]   ;;  %v1607_v9 = vld [vmem:[#allocation6 + $0x38] sm:$0xff]   ;;  %v1610_v10 = vld [vmem:[%s1966_s8 + $0x8] sm:$0xff]   ;;  %p1683_p4 = scmp.ne.s32.totalorder %s2089_s28, %s1682_s11  ;;  %s1774_s13 = smov [#allocation8]  }
  0x5e   : > { %1475 = vmatprep.mubr.bf16.mxu0 %v1608_v4  ;;  %1491 = vmatprep.mubr.bf16.mxu1 %v1609_v5  ;;  %v1611_v11 = vld [vmem:[%s1966_s8 + $0x48] sm:$0xff]   ;;  %v1612_v12 = vld [vmem:[%s1966_s8 + $0x10] sm:$0xff]   ;;  %v1614_v14 = vld [vmem:[%s1966_s8 + $0x18] sm:$0xff]   ;;  %s1686_s7 = sshll.u32 %s1774_s13, 4  ;;  %s1687_s7 = int_to_ptr.vmem [resolvable:$false] %s1686_s7 }
  0x5f   : > { %v1613_v13 = vld [vmem:[%s1966_s8 + $0x50] sm:$0xff]   ;;  %v1615_v15 = vld [vmem:[%s1966_s8 + $0x58] sm:$0xff]   ;;  %v1616_v16 = vld [vmem:[%s1966_s8 + $0x20] sm:$0xff]   ;;  %p1684_p6 = pnand %p1683_p4, %p1901_p10  ;;  %s1688_s24 = scalar_lea.vmem %s1687_s7, 4096 }
  0x60   : > { %1462 = vmatpush3.bf16.msra.mxu0 %v1601_v1  ;;  %1516 = vmatpush3.bf16.msra.mxu1 %v1601_v1  ;;  %v1617_v17 = vld [vmem:[%s1966_s8 + $0x60] sm:$0xff]   ;;  %v1618_v18 = vld [vmem:[%s1966_s8 + $0x28] sm:$0xff]   ;;  %v1620_v20 = vld [vmem:[%s1966_s8 + $0x30] sm:$0xff]   ;;  %p1689_p12 = scmp.lt.s32.totalorder %s2089_s28, %s1687_s7  ;;  %p1690_p11 = scmp.lt.s32.totalorder %s1688_s24, %s1682_s11 }
  0x61   : > { %1463 = vmatprep.subr.bf16.mxu0 %v1602_v2  ;;  %1509 = vmatprep.subr.bf16.mxu1 %v1602_v2  ;;  %v1619_v19 = vld [vmem:[%s1966_s8 + $0x68] sm:$0xff]   ;;  %v1621_v21 = vld [vmem:[%s1966_s8 + $0x70] sm:$0xff]   ;;  %v1622_v22 = vld [vmem:[%s1966_s8 + $0x38] sm:$0xff]   ;;  %p1685_p8 = pneg %p1684_p6 }
  0x62   : > { %v1623_v23 = vld [vmem:[%s1966_s8 + $0x78] sm:$0xff]   ;;  %v1995_v24 = vld [vmem:[%s2144_s2] ss:$0 sm:$0xff]  ;;  %p1691_p0 = por %p1690_p11, %p1689_p12 }
  0x63   : > { %v2000_v26 = vld [vmem:[%s2145_s3] ss:$0 sm:$0xff] }
  0x64   : > { %1464 = vmatpush3.bf16.msra.mxu0 %v1602_v2  ;;  %1517 = vmatpush3.bf16.msra.mxu1 %v1602_v2  ;;  %p1692_p5 = pnand %p1691_p0, %p1685_p8 }
  0x65   : > { %1465 = vmatprep.subr.bf16.mxu0 %v1603_v3  ;;  %1510 = vmatprep.subr.bf16.mxu1 %v1603_v3 }
  0x68   : > { %1466 = vmatpush3.bf16.msra.mxu0 %v1603_v3  ;;  %1518 = vmatpush3.bf16.msra.mxu1 %v1603_v3 }
  0x69   : > { %1467 = vmatprep.subr.bf16.mxu0 %v1604_v6  ;;  %1511 = vmatprep.subr.bf16.mxu1 %v1604_v6 }
  0x6c   : > { %1468 = vmatpush3.bf16.msra.mxu0 %v1604_v6  ;;  %1519 = vmatpush3.bf16.msra.mxu1 %v1604_v6 }
  0x6d   : > { %1469 = vmatprep.subr.bf16.mxu0 %v1605_v7  ;;  %1512 = vmatprep.subr.bf16.mxu1 %v1605_v7 }
  0x70   : > { %1470 = vmatpush3.bf16.msra.mxu0 %v1605_v7  ;;  %1520 = vmatpush3.bf16.msra.mxu1 %v1605_v7 }
  0x71   : > { %1471 = vmatprep.subr.bf16.mxu0 %v1606_v8  ;;  %1513 = vmatprep.subr.bf16.mxu1 %v1606_v8 }
  0x74   : > { %1472 = vmatpush3.bf16.msra.mxu0 %v1606_v8  ;;  %1521 = vmatpush3.bf16.msra.mxu1 %v1606_v8 }
  0x75   : > { %1473 = vmatprep.subr.bf16.mxu0 %v1607_v9  ;;  %1514 = vmatprep.subr.bf16.mxu1 %v1607_v9 }
  0x78   : > { %1474 = vmatpush3.bf16.msra.mxu0 %v1607_v9  ;;  %1522 = vmatpush3.bf16.msra.mxu1 %v1607_v9 }
  0x7b   : > { %1476 = vmatmul.mubr.bf16.vlgmr.msra.gmra.mrb[0].mxu0 %v1610_v10  ;;  %1492 = vmatmul.mubr.bf16.vlgmr.msra.gmra.mrb[0].mxu1 %v1611_v11 }
  0x7c   : > { %1479 = vmatprep.mubr.bf16.mxu0 %v1612_v12  ;;  %1495 = vmatprep.mubr.bf16.mxu1 %v1613_v13 }
  0x83   : > { %1480 = vmatmul.mubr.bf16.gmra.mrb[4].mxu0 %v1614_v14  ;;  %1496 = vmatmul.mubr.bf16.gmra.mrb[4].mxu1 %v1615_v15 }
  0x84   : > { %1483 = vmatprep.mubr.bf16.mxu0 %v1616_v16  ;;  %1499 = vmatprep.mubr.bf16.mxu1 %v1617_v17 }
  0x8b   : > { %1484 = vmatmul.mubr.bf16.gmra.mrb[8].mxu0 %v1618_v18  ;;  %1500 = vmatmul.mubr.bf16.gmra.mrb[8].mxu1 %v1619_v19 }
  0x8c   : > { %1487 = vmatprep.mubr.bf16.mxu0 %v1620_v20  ;;  %1503 = vmatprep.mubr.bf16.mxu1 %v1621_v21 }
  0x93   : > { %1488 = vmatmul.mubr.bf16.gmra.mrb[12].mxu0 %v1622_v22  ;;  %1504 = vmatmul.mubr.bf16.gmra.mrb[12].mxu1 %v1623_v23 }
 0x14e   : > { %v1477_v25 = vpop.f32.mrb[0].mxu0  ;;  %v1493_v27 = vpop.f32.mrb[0].mxu1 }
 0x14f   : > { %v827_v28 = vmul.f32 %v1477_v25, %v1995_v24  ;;  %v843_v29 = vmul.f32 %v1493_v27, %v1995_v24  ;;  %v592_v30 = vpop.f32.mrb[1].mxu0  ;;  %v656_v31 = vpop.f32.mrb[1].mxu1 }
 0x150   : > { %v825_v32 = vmul.f32 %v1995_v24, %v592_v30  ;;  %v841_v33 = vmul.f32 %v1995_v24, %v656_v31  ;;  %v1478_v34 = vpop.f32.mrb[2].mxu0  ;;  %v1494_v35 = vpop.f32.mrb[2].mxu1 }
 0x151   : > { %v866_v36 = vadd.f32 %v2000_v26, %v827_v28  ;;  %v882_v37 = vadd.f32 %v2000_v26, %v843_v29  ;;  %v828_v38 = vmul.f32 %v1478_v34, %v1995_v24  ;;  %v844_v39 = vmul.f32 %v1494_v35, %v1995_v24  ;;  %v595_v40 = vpop.f32.mrb[3].mxu0  ;;  %v659_v41 = vpop.f32.mrb[3].mxu1 }
 0x152   : > { %v864_v42 = vadd.f32 %v2000_v26, %v825_v32  ;;  %v880_v43 = vadd.f32 %v2000_v26, %v841_v33  ;;  %v826_v44 = vmul.f32 %v1995_v24, %v595_v40  ;;  %v842_v45 = vmul.f32 %v1995_v24, %v659_v41 }
 0x153   : > { %v867_v46 = vadd.f32 %v2000_v26, %v828_v38  ;;  %v883_v47 = vadd.f32 %v2000_v26, %v844_v39  ;;  %v898_v50 = vmax.f32 %v866_v36, 0.0  ;;  %v914_v51 = vmax.f32 %v882_v37, 0.0 }
 0x154   : > { %v865_v48 = vadd.f32 %v2000_v26, %v826_v44  ;;  %v881_v49 = vadd.f32 %v2000_v26, %v842_v45  ;;  %v896_v54 = vmax.f32 %v864_v42, 0.0  ;;  %v912_v55 = vmax.f32 %v880_v43, 0.0 }
 0x155   : > { %v899_v52 = vmax.f32 %v867_v46, 0.0  ;;  %v915_v53 = vmax.f32 %v883_v47, 0.0 }
 0x156   : > { %v897_v56 = vmax.f32 %v865_v48, 0.0  ;;  %v913_v57 = vmax.f32 %v881_v49, 0.0  ;;  %v1481_v58 = vpop.f32.mrb[4].mxu0  ;;  %v1497_v59 = vpop.f32.mrb[4].mxu1 }
 0x157   : > { %v1348_v60 = vpack.c.bf16 %v899_v52, %v898_v50  ;;  %v1388_v61 = vpack.c.bf16 %v915_v53, %v914_v51  ;;  %v831_v62 = vmul.f32 %v1481_v58, %v1995_v24  ;;  %v847_v63 = vmul.f32 %v1497_v59, %v1995_v24  ;;  %v608_v0 = vpop.f32.mrb[5].mxu0  ;;  %v672_v1 = vpop.f32.mrb[5].mxu1 }
 0x158   : > { %v1343_v2 = vpack.c.bf16 %v897_v56, %v896_v54  ;;  %v1383_v3 = vpack.c.bf16 %v913_v57, %v912_v55  ;;  %v829_v4 = vmul.f32 %v1995_v24, %v608_v0  ;;  %v845_v5 = vmul.f32 %v1995_v24, %v672_v1  ;;  %v1482_v6 = vpop.f32.mrb[6].mxu0  ;;  %v1498_v7 = vpop.f32.mrb[6].mxu1 }
 0x159   : > { %1420 = vst [vmem:[%s2024_s21 + $0x8] sm:$0xff] %v1348_v60   ;;  %1428 = vst [vmem:[%s2024_s21 + $0x48] sm:$0xff] %v1388_v61   ;;  %v870_v8 = vadd.f32 %v2000_v26, %v831_v62  ;;  %v886_v9 = vadd.f32 %v2000_v26, %v847_v63  ;;  %v832_v10 = vmul.f32 %v1482_v6, %v1995_v24  ;;  %v611_v12 = vpop.f32.mrb[7].mxu0  ;;  %v675_v13 = vpop.f32.mrb[7].mxu1 }
 0x15a   : > { %v848_v11 = vmul.f32 %v1498_v7, %v1995_v24  ;;  %1344 = vst [vmem:[%s2024_s21] sm:$0xff] %v1343_v2   ;;  %1427 = vst [vmem:[%s2024_s21 + $0x40] sm:$0xff] %v1383_v3   ;;  %v868_v14 = vadd.f32 %v2000_v26, %v829_v4  ;;  %v884_v15 = vadd.f32 %v2000_v26, %v845_v5 }
 0x15b   : > { %v830_v16 = vmul.f32 %v1995_v24, %v611_v12  ;;  %v846_v17 = vmul.f32 %v1995_v24, %v675_v13  ;;  %v871_v18 = vadd.f32 %v2000_v26, %v832_v10  ;;  %v902_v22 = vmax.f32 %v870_v8, 0.0 }
 0x15c   : > { %v887_v19 = vadd.f32 %v2000_v26, %v848_v11  ;;  %v918_v23 = vmax.f32 %v886_v9, 0.0  ;;  %v900_v28 = vmax.f32 %v868_v14, 0.0  ;;  %v916_v29 = vmax.f32 %v884_v15, 0.0 }
 0x15d   : > { %v869_v20 = vadd.f32 %v2000_v26, %v830_v16  ;;  %v885_v21 = vadd.f32 %v2000_v26, %v846_v17  ;;  %v903_v25 = vmax.f32 %v871_v18, 0.0 }
 0x15e   : > { %v919_v27 = vmax.f32 %v887_v19, 0.0  ;;  %v1485_v32 = vpop.f32.mrb[8].mxu0  ;;  %v1501_v33 = vpop.f32.mrb[8].mxu1 }
 0x15f   : > { %v901_v30 = vmax.f32 %v869_v20, 0.0  ;;  %v917_v31 = vmax.f32 %v885_v21, 0.0  ;;  %v1358_v34 = vpack.c.bf16 %v903_v25, %v902_v22  ;;  %v835_v36 = vmul.f32 %v1485_v32, %v1995_v24  ;;  %v624_v38 = vpop.f32.mrb[9].mxu0  ;;  %v688_v39 = vpop.f32.mrb[9].mxu1 }
 0x160   : > { %v1398_v35 = vpack.c.bf16 %v919_v27, %v918_v23  ;;  %v851_v37 = vmul.f32 %v1501_v33, %v1995_v24  ;;  %v833_v42 = vmul.f32 %v1995_v24, %v624_v38  ;;  %v849_v43 = vmul.f32 %v1995_v24, %v688_v39  ;;  %v1486_v44 = vpop.f32.mrb[10].mxu0  ;;  %v1502_v45 = vpop.f32.mrb[10].mxu1 }
 0x161   : > { %v1353_v40 = vpack.c.bf16 %v901_v30, %v900_v28  ;;  %v1393_v41 = vpack.c.bf16 %v917_v31, %v916_v29  ;;  %1422 = vst [vmem:[%s2024_s21 + $0x18] sm:$0xff] %v1358_v34   ;;  %v874_v46 = vadd.f32 %v2000_v26, %v835_v36  ;;  %v836_v48 = vmul.f32 %v1486_v44, %v1995_v24  ;;  %v627_v50 = vpop.f32.mrb[11].mxu0  ;;  %v691_v51 = vpop.f32.mrb[11].mxu1 }
 0x162   : > { %1430 = vst [vmem:[%s2024_s21 + $0x58] sm:$0xff] %v1398_v35   ;;  %v890_v47 = vadd.f32 %v2000_v26, %v851_v37  ;;  %v852_v49 = vmul.f32 %v1502_v45, %v1995_v24  ;;  %v872_v52 = vadd.f32 %v2000_v26, %v833_v42  ;;  %v888_v53 = vadd.f32 %v2000_v26, %v849_v43 }
 0x163   : > { %1421 = vst [vmem:[%s2024_s21 + $0x10] sm:$0xff] %v1353_v40   ;;  %1429 = vst [vmem:[%s2024_s21 + $0x50] sm:$0xff] %v1393_v41   ;;  %v834_v54 = vmul.f32 %v1995_v24, %v627_v50  ;;  %v850_v55 = vmul.f32 %v1995_v24, %v691_v51  ;;  %v875_v56 = vadd.f32 %v2000_v26, %v836_v48  ;;  %v906_v60 = vmax.f32 %v874_v46, 0.0 }
 0x164   : > { %v891_v57 = vadd.f32 %v2000_v26, %v852_v49  ;;  %v922_v61 = vmax.f32 %v890_v47, 0.0  ;;  %v904_v0 = vmax.f32 %v872_v52, 0.0  ;;  %v920_v1 = vmax.f32 %v888_v53, 0.0 }
 0x165   : > { %v873_v58 = vadd.f32 %v2000_v26, %v834_v54  ;;  %v889_v59 = vadd.f32 %v2000_v26, %v850_v55  ;;  %v907_v62 = vmax.f32 %v875_v56, 0.0 }
 0x166   : > { %v923_v63 = vmax.f32 %v891_v57, 0.0  ;;  %v1489_v4 = vpop.f32.mrb[12].mxu0  ;;  %v1505_v5 = vpop.f32.mrb[12].mxu1 }
 0x167   : > { %v905_v2 = vmax.f32 %v873_v58, 0.0  ;;  %v921_v3 = vmax.f32 %v889_v59, 0.0  ;;  %v1368_v6 = vpack.c.bf16 %v907_v62, %v906_v60  ;;  %v839_v8 = vmul.f32 %v1489_v4, %v1995_v24  ;;  %v640_v10 = vpop.f32.mrb[13].mxu0  ;;  %v704_v11 = vpop.f32.mrb[13].mxu1 }
 0x168   : > { %v1408_v7 = vpack.c.bf16 %v923_v63, %v922_v61  ;;  %v855_v9 = vmul.f32 %v1505_v5, %v1995_v24  ;;  %v837_v14 = vmul.f32 %v1995_v24, %v640_v10  ;;  %v853_v15 = vmul.f32 %v1995_v24, %v704_v11  ;;  %v1490_v16 = vpop.f32.mrb[14].mxu0  ;;  %v1506_v17 = vpop.f32.mrb[14].mxu1 }
 0x169   : > { %v1363_v12 = vpack.c.bf16 %v905_v2, %v904_v0  ;;  %v1403_v13 = vpack.c.bf16 %v921_v3, %v920_v1  ;;  %1424 = vst [vmem:[%s2024_s21 + $0x28] sm:$0xff] %v1368_v6   ;;  %v878_v18 = vadd.f32 %v2000_v26, %v839_v8  ;;  %v840_v20 = vmul.f32 %v1490_v16, %v1995_v24  ;;  %v643_v22 = vpop.f32.mrb[15].mxu0  ;;  %v707_v23 = vpop.f32.mrb[15].mxu1 }
 0x16a   : > { %1432 = vst [vmem:[%s2024_s21 + $0x68] sm:$0xff] %v1408_v7   ;;  %v894_v19 = vadd.f32 %v2000_v26, %v855_v9  ;;  %v856_v21 = vmul.f32 %v1506_v17, %v1995_v24  ;;  %v876_v25 = vadd.f32 %v2000_v26, %v837_v14  ;;  %v892_v27 = vadd.f32 %v2000_v26, %v853_v15 }
 0x16b   : > { %1423 = vst [vmem:[%s2024_s21 + $0x20] sm:$0xff] %v1363_v12   ;;  %1431 = vst [vmem:[%s2024_s21 + $0x60] sm:$0xff] %v1403_v13   ;;  %v838_v28 = vmul.f32 %v1995_v24, %v643_v22  ;;  %v854_v29 = vmul.f32 %v1995_v24, %v707_v23  ;;  %v879_v30 = vadd.f32 %v2000_v26, %v840_v20  ;;  %v910_v34 = vmax.f32 %v878_v18, 0.0 }
 0x16c   : > { %v895_v31 = vadd.f32 %v2000_v26, %v856_v21  ;;  %v926_v35 = vmax.f32 %v894_v19, 0.0  ;;  %v908_v24 = vmax.f32 %v876_v25, 0.0  ;;  %v924_v38 = vmax.f32 %v892_v27, 0.0 }
 0x16d   : > { %v877_v32 = vadd.f32 %v2000_v26, %v838_v28  ;;  %v893_v33 = vadd.f32 %v2000_v26, %v854_v29  ;;  %v911_v36 = vmax.f32 %v879_v30, 0.0 }
 0x16e   : > { %v927_v37 = vmax.f32 %v895_v31, 0.0 }
 0x16f   : > { %v909_v39 = vmax.f32 %v877_v32, 0.0  ;;  %v925_v40 = vmax.f32 %v893_v33, 0.0  ;;  %v1378_v41 = vpack.c.bf16 %v911_v36, %v910_v34 }
 0x170   : > { %v1418_v42 = vpack.c.bf16 %v927_v37, %v926_v35 }
 0x171   : > { %v1373_v26 = vpack.c.bf16 %v909_v39, %v908_v24  ;;  %v1413_v43 = vpack.c.bf16 %v925_v40, %v924_v38  ;;  %1426 = vst [vmem:[%s2024_s21 + $0x38] sm:$0xff] %v1378_v41  }
 0x172   : > { %1434 = vst [vmem:[%s2024_s21 + $0x78] sm:$0xff] %v1418_v42  }
 0x173   : > { %1425 = vst [vmem:[%s2024_s21 + $0x30] sm:$0xff] %v1373_v26   ;;  %1433 = vst [vmem:[%s2024_s21 + $0x70] sm:$0xff] %v1413_v43  }
 0x174   : > { %1695 = shalt.err (!%p1692_p5)
}
 0x175   : > { %s1696_s8 = scalar_lea.hbm %s2087_s18, 2048  ;;  %s1700_s27 = scalar_lea.hbm %s2146_s4, 4096 }
 0x176   : > { %p1697_p9 = scmp.ne.s32.totalorder %s2087_s18, %s1696_s8  ;;  %p1701_p3 = scmp.lt.u32.totalorder %s2087_s18, %s2146_s4 }
 0x177   : > { %p1702_p7 = scmp.lt.u32.totalorder %s1700_s27, %s1696_s8  ;;  %p1704_p4 = scmp.lt.u32.totalorder %s1696_s8, %s2087_s18 }
 0x178   : > { %p1698_p1 = pnand %p1697_p9, %p1901_p10 }
 0x179   : > { %p1703_p13 = por %p1702_p7, %p1701_p3 }
 0x17a   : > { %p1699_p2 = pneg %p1698_p1 }
 0x17b   : > { %p1705_p6 = por %p1704_p4, %p1703_p13 }
 0x17d   : > { %p1706_p8 = pnand %p1705_p6, %p1699_p2 }
 0x17f   : > { %1709 = shalt.err (!%p1706_p8)
}
 0x180   : > { %s1775_s22 = smov 64   ;;  %s1776_s6 = smov 4  }
 0x181   : > { %1529 = dma.vmem_to_hbm [thread:$0]  (%p1901_p10), %s2089_s28, 2048, %s2087_s18, %s1089_s9, %s1775_s22, %s1775_s22, %s1776_s6  }
 0x182 PF: > { %s1118_s29 = sand.u32 1, %s1748_s15   ;;  %p2164_p12 = scmp.ne.s32.totalorder %s2154_s26, 0 }
 0x183   : > { %p2165_p11 = scmp.ge.s32.totalorder %s1768_s20, 2  ;;  %s1119_s11 = scalar_lea.sflag [#allocation5], %s1118_s29 }
 0x185   : > { %p1540_p0 = pnand %p2165_p11, %p2164_p12 }
 0x187   : > { %1743 = dma.done.wait (!%p1540_p0), %s1119_s11, 2048  }
 0x188   : > { %1745 = vsyncadd (!%p1540_p0), %s1119_s11, 4294965248  ;;  %s21_s20 = sadd.s32 1, %s1768_s20   ;;  %s2166_s15 = smov %s1752_s16 }
 0x189   : > { %p18_p5 = scmp.ge.s32.totalorder %s21_s20, 4   ;;  %s2167_s16 = smov %s1756_s17 }
 0x18a   : > { %s2168_s17 = smov %s1910_s10  ;;  %s2169_s18 = smov %s1764_s19 }
 0x18b   : > { %s2170_s19 = smov %s2172_s5  ;;  %20 = sbr.rel (!%p18_p5) target bundleno = 7 (0x7), region = 100 }
 0x192   :  { %1124 = vsyncpa [#allocation4], 1 }
 0x193   :  { %1126 = vsyncpa [#allocation4 + $0x1], 1 }
 0x194   :  { %1127 = vsyncpa [#allocation7], 1 }
 0x195   :  { %1128 = vsyncpa [#allocation5], 1 }
 0x196   :  { %1130 = vsyncpa [#allocation5 + $0x1], 1 }

</bundles_post_ra>
